<compile_context>
chip_gen: v7x
topology: tpu7x:2x2x1
jax: 0.10.0
libtpu: 0.0.40
codegen_flags: <defaults>
</compile_context>

<pallas_src>
import functools
import math

import jax
import jax.numpy as jnp
from jax.experimental import pallas as pl
from jax.experimental.pallas import tpu as pltpu

_MIB = 1024 * 1024

# Abramowitz & Stegun 7.1.26 rational erf approximation, |abs err| <= 1.5e-7.
_ERF_P = 0.3275911
_ERF_A1 = 0.254829592
_ERF_A2 = -0.284496736
_ERF_A3 = 1.421413741
_ERF_A4 = -1.453152027
_ERF_A5 = 1.061405429


def _erf(z):
    # Built from mul/add/div/select/exp only (exp goes to the EUP slot).
    s = jnp.where(z >= 0.0, 1.0, -1.0)
    a = jnp.abs(z)
    t = 1.0 / (1.0 + _ERF_P * a)
    poly = t * (_ERF_A1 + t * (_ERF_A2 + t * (_ERF_A3 + t * (_ERF_A4 + t * _ERF_A5))))
    return s * (1.0 - poly * jnp.exp(-(a * a)))


def _gelu(h, approximate):
    if approximate:
        # tanh approximation -> EUP slot, frees the VALU (perf option).
        c = 0.7978845608028654  # sqrt(2/pi)
        return 0.5 * h * (1.0 + jnp.tanh(c * (h + 0.044715 * (h * h * h))))
    # exact (erf-based) GELU -- matches torch.nn.functional.gelu default.
    return 0.5 * h * (1.0 + _erf(h * 0.7071067811865476))


# ----------------------------------------------------------------------------
# Kernels
# ----------------------------------------------------------------------------
def _mlp_kernel_full(x_ref, w1_ref, b1_ref, w2_ref, b2_ref, o_ref, *, approximate):
    # Full-M path: both weights VMEM-resident (constant block index => fetched
    # from HBM once for the whole grid).  No reduction axis, no accumulator RMW.
    h = jnp.dot(x_ref[...], w1_ref[...], preferred_element_type=jnp.float32)
    h = _gelu(h + b1_ref[...].astype(jnp.float32), approximate)
    # TODO(synk): dropout omitted -- inference mode (Dropout is identity).
    y = jnp.dot(h.astype(w2_ref.dtype), w2_ref[...], preferred_element_type=jnp.float32)
    o_ref[...] = (y + b2_ref[...].astype(jnp.float32)).astype(o_ref.dtype)


def _mlp_kernel_tiled(x_ref, w1_ref, b1_ref, w2_ref, b2_ref, o_ref, acc_ref,
                      *, approximate):
    # Tiled-M path: mlp_dim streamed in TM slices; fc2 partials accumulated in
    # an f32 VMEM scratch resident across the reduction (last) grid axis.
    k = pl.program_id(1)

    h = jnp.dot(x_ref[...], w1_ref[...], preferred_element_type=jnp.float32)
    h = _gelu(h + b1_ref[...].astype(jnp.float32), approximate)
    partial = jnp.dot(h.astype(w2_ref.dtype), w2_ref[...],
                      preferred_element_type=jnp.float32)

    @pl.when(k == 0)
    def _():
        acc_ref[...] = partial            # direct store: no memset + RMW on step 0

    @pl.when(k > 0)
    def _():
        acc_ref[...] += partial

    @pl.when(k == pl.num_programs(1) - 1)
    def _():
        o_ref[...] = (acc_ref[...] + b2_ref[...].astype(jnp.float32)).astype(o_ref.dtype)


# ----------------------------------------------------------------------------
# Wrapper
# ----------------------------------------------------------------------------
def _vmem_capacity_bytes():
    try:
        info = pltpu.get_tpu_info()
        cap = getattr(info, "vmem_capacity_bytes", None)
        if cap:
            return int(cap)
    except Exception:
        pass
    return 64 * _MIB  # conservative (v7x-sized) fallback


def _round_up(a, b):
    return pl.cdiv(a, b) * b


@functools.partial(
    jax.jit,
    static_argnames=("token_block", "m_block", "approximate_gelu",
                     "cast_to_bf16", "force_m_tiling"))
def mlp_pallas(x, w1, b1, w2, b2, *, token_block=None, m_block=512,
               approximate_gelu=False, cast_to_bf16=False, force_m_tiling=False):
    """ViT Mlp forward: fc2(gelu(fc1(x))).

    x: [B, S, H]; w1: [H, M]; b1: [M]; w2: [M, H]; b2: [H].
    Weights are stored [in, out] (torch Linear stores [out, in] and applies
    x @ W.T -- same math).
    """
    B, S, H = x.shape
    M = w1.shape[1]
    tokens = B * S
    out_dtype = x.dtype

    if cast_to_bf16:
        # bf16-native MXU fast path (f32 MXU is multi-pass emulation on v5e/v6e
        # and v7x's MXU is bf16/fp8-native); biases & accumulation stay f32.
        x = x.astype(jnp.bfloat16)
        w1 = w1.astype(jnp.bfloat16)
        w2 = w2.astype(jnp.bfloat16)

    bx = jnp.dtype(x.dtype).itemsize
    bw1 = jnp.dtype(w1.dtype).itemsize
    bw2 = jnp.dtype(w2.dtype).itemsize
    bo = jnp.dtype(out_dtype).itemsize

    sub = 16 if bx < 4 else 8            # sublane tile (packed dtypes use 16 rows)

    # --- per-generation VMEM budget & token-tile default ---------------------
    vmem_cap = _vmem_capacity_bytes()
    vmem_budget = int(0.75 * vmem_cap)   # ~48 MiB on v7x, ~96 MiB on v5e/v6e

    if token_block is None:
        # Intensity on re-streamed weights ~ 2*TB/bytes_per_elem flop/B; TB must
        # sit above the HBM roofline (v6e ~640, v7x ~311, v5e ~240 flop/B).
        TB = 1024 if vmem_cap > 64 * _MIB else 512   # v5e/v6e vs v7x
    else:
        TB = token_block
    TB = _round_up(max(TB, sub), sub)

    if tokens < TB:
        # Small inputs: keep >= 2 token tiles so the "parallel" token axis can
        # still spread over both TensorCores on v7x.
        if tokens >= 2 * sub:
            TB = _round_up(pl.cdiv(tokens, 2), sub)
        else:
            TB = _round_up(max(tokens, 1), sub)

    # --- choose full-M (weights resident) vs tiled-M (streamed) path ---------
    weight_bytes = H * M * bw1 + M * bw1 + M * H * bw2 + H * bw2
    full_path_bytes = (2 * weight_bytes              # double-buffered weight allocs
                       + 2 * TB * H * (bx + bo)      # x/out tiles, double-buffered
                       + TB * M * (4 + bw2))         # f32 h + its cast copy
    use_full = (not force_m_tiling) and (full_path_bytes + 8 * _MIB <= vmem_budget)

    if use_full:
        TM = M
    else:
        # Largest 128-multiple divisor of M that is <= m_block.
        TM = None
        cand = (min(m_block, M) // 128) * 128
        while cand >= 128:
            if M % cand == 0:
                TM = cand
                break
            cand -= 128
        if TM is None:
            # TODO(synk): mlp_dim not a multiple of 128 -- last-resort full-M
            # residency (can exceed VMEM for very large, odd mlp_dim).
            TM = M

    # --- pad tokens so the token grid axis is exact ---------------------------
    padded_tokens = _round_up(tokens, TB)
    x2d = x.reshape(tokens, H)
    if padded_tokens != tokens:
        x2d = jnp.pad(x2d, ((0, padded_tokens - tokens), (0, 0)))
    n_tok_tiles = padded_tokens // TB

    b1_2d = b1.reshape(1, M)
    b2_2d = b2.reshape(1, H)

    # --- grid / specs ---------------------------------------------------------
    if use_full:
        kernel = functools.partial(_mlp_kernel_full, approximate=approximate_gelu)
        grid = (n_tok_tiles,)
        in_specs = [
            pl.BlockSpec((TB, H), lambda i: (i, 0)),     # x tile
            pl.BlockSpec((H, M), lambda i: (0, 0)),      # w1 (resident)
            pl.BlockSpec((1, M), lambda i: (0, 0)),      # b1
            pl.BlockSpec((M, H), lambda i: (0, 0)),      # w2 (resident)
            pl.BlockSpec((1, H), lambda i: (0, 0)),      # b2
        ]
        out_specs = pl.BlockSpec((TB, H), lambda i: (i, 0))
        scratch_shapes = ()
        dim_semantics = ("parallel",)
        weight_reads = 1
    else:
        kernel = functools.partial(_mlp_kernel_tiled, approximate=approximate_gelu)
        grid = (n_tok_tiles, M // TM)
        in_specs = [
            pl.BlockSpec((TB, H), lambda i, k: (i, 0)),  # x tile
            pl.BlockSpec((H, TM), lambda i, k: (0, k)),  # w1 slice
            pl.BlockSpec((1, TM), lambda i, k: (0, k)),  # b1 slice
            pl.BlockSpec((TM, H), lambda i, k: (k, 0)),  # w2 slice
            pl.BlockSpec((1, H), lambda i, k: (0, 0)),   # b2
        ]
        out_specs = pl.BlockSpec((TB, H), lambda i, k: (i, 0))
        scratch_shapes = (pltpu.VMEM((TB, H), jnp.float32),)
        dim_semantics = ("parallel", "arbitrary")
        weight_reads = n_tok_tiles

    # --- VMEM limit: generous but always below the physical per-core cap -----
    est = (2 * (TB * H * bx + H * TM * bw1 + TM * bw1 + TM * H * bw2 + H * bw2
                + TB * H * bo)
           + TB * H * 4                       # f32 accumulator (tiled path)
           + TB * TM * (4 + bw2))             # f32 h + cast copy
    vmem_limit = min(vmem_budget, max(32 * _MIB, int(1.3 * est)))

    cost = pl.CostEstimate(
        flops=2 * padded_tokens * H * M * 2,          # fc1 + fc2 matmuls
        transcendentals=padded_tokens * M,            # one exp/tanh per activation
        bytes_accessed=(padded_tokens * H * bx
                        + weight_reads * weight_bytes
                        + padded_tokens * H * bo))

    out = pl.pallas_call(
        kernel,
        out_shape=jax.ShapeDtypeStruct((padded_tokens, H), out_dtype),
        grid_spec=pltpu.PrefetchScalarGridSpec(
            num_scalar_prefetch=0,
            grid=grid,
            in_specs=in_specs,
            out_specs=out_specs,
            scratch_shapes=scratch_shapes,
        ),
        compiler_params=pltpu.CompilerParams(
            dimension_semantics=dim_semantics,
            vmem_limit_bytes=vmem_limit,
        ),
        cost_estimate=cost,
    )(x2d, w1, b1_2d, w2, b2_2d)

    if padded_tokens != tokens:
        out = out[:tokens]
    return out.reshape(B, S, H)


# ----------------------------------------------------------------------------
# Reference + test
# ----------------------------------------------------------------------------
def _xavier_uniform(key, fan_in, fan_out, dtype=jnp.float32):
    # matches torch.nn.init.xavier_uniform_ (gain=1)
    limit = math.sqrt(6.0 / (fan_in + fan_out))
    return jax.random.uniform(key, (fan_in, fan_out), dtype=dtype,
                              minval=-limit, maxval=limit)


def _reference_mlp(x, w1, b1, w2, b2):
    h = jnp.einsum("bsh,hm->bsm", x, w1,
                   precision=jax.lax.Precision.HIGHEST) + b1
    h = jax.nn.gelu(h, approximate=False)
    y = jnp.einsum("bsm,mh->bsh", h, w2,
                   precision=jax.lax.Precision.HIGHEST) + b2
    return y


def _make_params(key, H, M):
    kx, kw1, kb1, kw2, kb2 = jax.random.split(key, 5)
    w1 = _xavier_uniform(kw1, H, M)
    b1 = 1e-6 * jax.random.normal(kb1, (M,), dtype=jnp.float32)
    w2 = _xavier_uniform(kw2, M, H)
    b2 = 1e-6 * jax.random.normal(kb2, (H,), dtype=jnp.float32)
    return kx, w1, b1, w2, b2


if __name__ == "__main__":
    # Tolerance is loose enough to cover the TPU's default (bf16-based) f32
    # matmul precision while still catching structural/tiling/bias errors.
    TOL = 2e-2

    # Case 1 (module config: hidden_size=32, mlp_dim=64) -> full-M resident path.
    B, S, H, M = 2, 8, 32, 64
    kx, w1, b1, w2, b2 = _make_params(jax.random.PRNGKey(0), H, M)
    x = jax.random.normal(kx, (B, S, H), dtype=jnp.float32)

    out = jax.block_until_ready(mlp_pallas(x, w1, b1, w2, b2))
    ref = _reference_mlp(x, w1, b1, w2, b2)
    assert out.shape == (B, S, H)
    assert bool(jnp.allclose(out, ref, atol=TOL, rtol=TOL)), "mismatch (full path)"

    # Case 2: exercise the tiled-M reduction path (k grid axis + f32 accumulator).
    B2, S2, H2, M2 = 2, 16, 128, 256
    kx2, w1b, b1b, w2b, b2b = _make_params(jax.random.PRNGKey(1), H2, M2)
    x2 = jax.random.normal(kx2, (B2, S2, H2), dtype=jnp.float32)

    out2 = jax.block_until_ready(
        mlp_pallas(x2, w1b, b1b, w2b, b2b, m_block=128, force_m_tiling=True))
    ref2 = _reference_mlp(x2, w1b, b1b, w2b, b2b)
    assert out2.shape == (B2, S2, H2)
    assert bool(jnp.allclose(out2, ref2, atol=TOL, rtol=TOL)), "mismatch (tiled path)"

    print("KERNEL_OK")
</pallas_src>

<mosaic_0001>
module attributes {stable_mosaic.version = 11 : i64} {
  func.func @_mlp_kernel_full(%arg0: i32, %arg1: memref<8x32xf32, #tpu.memory_space<vmem>>, %arg2: memref<32x64xf32, #tpu.memory_space<vmem>>, %arg3: memref<1x64xf32, #tpu.memory_space<vmem>>, %arg4: memref<64x32xf32, #tpu.memory_space<vmem>>, %arg5: memref<1x32xf32, #tpu.memory_space<vmem>>, %arg6: memref<8x32xf32, #tpu.memory_space<vmem>>) attributes {dimension_semantics = [#tpu.dimension_semantics<parallel>], iteration_bounds = array<i64: 2>, scalar_prefetch = 0 : i64, scratch_operands = 0 : i64, tpu.core_type = #tpu.core_type<tc>, window_params = [{transform_indices = @transform_0, window_bounds = array<i64: 8, 32>}, {pipeline_mode = #tpu.pipeline_mode<synchronous>, transform_indices = @transform_1, window_bounds = array<i64: 32, 64>}, {pipeline_mode = #tpu.pipeline_mode<synchronous>, transform_indices = @transform_2, window_bounds = array<i64: 1, 64>}, {pipeline_mode = #tpu.pipeline_mode<synchronous>, transform_indices = @transform_3, window_bounds = array<i64: 64, 32>}, {pipeline_mode = #tpu.pipeline_mode<synchronous>, transform_indices = @transform_4, window_bounds = array<i64: 1, 32>}, {transform_indices = @transform_5, window_bounds = array<i64: 8, 32>}]} {
    %c0 = arith.constant 0 : index
    %c0_0 = arith.constant 0 : index
    %0 = vector.load %arg1[%c0, %c0_0] : memref<8x32xf32, #tpu.memory_space<vmem>>, vector<8x32xf32>
    %c0_1 = arith.constant 0 : index
    %c0_2 = arith.constant 0 : index
    %1 = vector.load %arg2[%c0_1, %c0_2] : memref<32x64xf32, #tpu.memory_space<vmem>>, vector<32x64xf32>
    %cst = arith.constant dense<0.000000e+00> : vector<8x64xf32>
    %2 = tpu.matmul %0, %1, %cst {dimension_numbers = #tpu.dot_dimension_numbers<[1], [0], [0], [1], [0, 0, 1, 1], [], []>} : vector<8x32xf32>, vector<32x64xf32>, vector<8x64xf32> -> vector<8x64xf32>
    %c0_3 = arith.constant 0 : index
    %c0_4 = arith.constant 0 : index
    %3 = vector.load %arg3[%c0_3, %c0_4] : memref<1x64xf32, #tpu.memory_space<vmem>>, vector<1x64xf32>
    %4 = vector.broadcast %3 : vector<1x64xf32> to vector<8x64xf32>
    %5 = arith.addf %2, %4 : vector<8x64xf32>
    %cst_5 = arith.constant 5.000000e-01 : f32
    %6 = vector.broadcast %cst_5 : f32 to vector<8x64xf32>
    %7 = arith.mulf %6, %5 : vector<8x64xf32>
    %cst_6 = arith.constant 0.707106769 : f32
    %8 = vector.broadcast %cst_6 : f32 to vector<8x64xf32>
    %9 = arith.mulf %5, %8 : vector<8x64xf32>
    %cst_7 = arith.constant 0.000000e+00 : f32
    %10 = vector.broadcast %cst_7 : f32 to vector<8x64xf32>
    %11 = arith.cmpf oge, %9, %10 : vector<8x64xf32>
    %cst_8 = arith.constant 1.000000e+00 : f32
    %cst_9 = arith.constant -1.000000e+00 : f32
    %12 = vector.broadcast %cst_8 : f32 to vector<8x64xf32>
    %13 = vector.broadcast %cst_9 : f32 to vector<8x64xf32>
    %14 = arith.select %11, %12, %13 : vector<8x64xi1>, vector<8x64xf32>
    %15 = math.absf %9 : vector<8x64xf32>
    %cst_10 = arith.constant 0.327591091 : f32
    %16 = vector.broadcast %cst_10 : f32 to vector<8x64xf32>
    %17 = arith.mulf %16, %15 : vector<8x64xf32>
    %cst_11 = arith.constant 1.000000e+00 : f32
    %18 = vector.broadcast %cst_11 : f32 to vector<8x64xf32>
    %19 = arith.addf %18, %17 : vector<8x64xf32>
    %cst_12 = arith.constant 1.000000e+00 : f32
    %20 = vector.broadcast %cst_12 : f32 to vector<8x64xf32>
    %21 = arith.divf %20, %19 : vector<8x64xf32>
    %cst_13 = arith.constant 1.06140542 : f32
    %22 = vector.broadcast %cst_13 : f32 to vector<8x64xf32>
    %23 = arith.mulf %21, %22 : vector<8x64xf32>
    %cst_14 = arith.constant -1.45315206 : f32
    %24 = vector.broadcast %cst_14 : f32 to vector<8x64xf32>
    %25 = arith.addf %24, %23 : vector<8x64xf32>
    %26 = arith.mulf %21, %25 : vector<8x64xf32>
    %cst_15 = arith.constant 1.42141378 : f32
    %27 = vector.broadcast %cst_15 : f32 to vector<8x64xf32>
    %28 = arith.addf %27, %26 : vector<8x64xf32>
    %29 = arith.mulf %21, %28 : vector<8x64xf32>
    %cst_16 = arith.constant -0.284496725 : f32
    %30 = vector.broadcast %cst_16 : f32 to vector<8x64xf32>
    %31 = arith.addf %30, %29 : vector<8x64xf32>
    %32 = arith.mulf %21, %31 : vector<8x64xf32>
    %cst_17 = arith.constant 0.254829586 : f32
    %33 = vector.broadcast %cst_17 : f32 to vector<8x64xf32>
    %34 = arith.addf %33, %32 : vector<8x64xf32>
    %35 = arith.mulf %21, %34 : vector<8x64xf32>
    %36 = arith.mulf %15, %15 : vector<8x64xf32>
    %cst_18 = arith.constant 0.000000e+00 : f32
    %37 = vector.broadcast %cst_18 : f32 to vector<8x64xf32>
    %38 = arith.subf %37, %36 : vector<8x64xf32>
    %39 = math.exp %38 : vector<8x64xf32>
    %40 = arith.mulf %35, %39 : vector<8x64xf32>
    %cst_19 = arith.constant 1.000000e+00 : f32
    %41 = vector.broadcast %cst_19 : f32 to vector<8x64xf32>
    %42 = arith.subf %41, %40 : vector<8x64xf32>
    %43 = arith.mulf %14, %42 : vector<8x64xf32>
    %cst_20 = arith.constant 1.000000e+00 : f32
    %44 = vector.broadcast %cst_20 : f32 to vector<8x64xf32>
    %45 = arith.addf %44, %43 : vector<8x64xf32>
    %46 = arith.mulf %7, %45 : vector<8x64xf32>
    %c0_21 = arith.constant 0 : index
    %c0_22 = arith.constant 0 : index
    %47 = vector.load %arg4[%c0_21, %c0_22] : memref<64x32xf32, #tpu.memory_space<vmem>>, vector<64x32xf32>
    %cst_23 = arith.constant dense<0.000000e+00> : vector<8x32xf32>
    %48 = tpu.matmul %46, %47, %cst_23 {dimension_numbers = #tpu.dot_dimension_numbers<[1], [0], [0], [1], [0, 0, 1, 1], [], []>} : vector<8x64xf32>, vector<64x32xf32>, vector<8x32xf32> -> vector<8x32xf32>
    %c0_24 = arith.constant 0 : index
    %c0_25 = arith.constant 0 : index
    %49 = vector.load %arg5[%c0_24, %c0_25] : memref<1x32xf32, #tpu.memory_space<vmem>>, vector<1x32xf32>
    %50 = vector.broadcast %49 : vector<1x32xf32> to vector<8x32xf32>
    %51 = arith.addf %48, %50 : vector<8x32xf32>
    %c0_26 = arith.constant 0 : index
    %c0_27 = arith.constant 0 : index
    %52 = vector.load %arg6[%c0_26, %c0_27] : memref<8x32xf32, #tpu.memory_space<vmem>>, vector<8x32xf32>
    tpu.vector_store %arg6[%c0_26, %c0_27], %51 {strides = array<i32>} : memref<8x32xf32, #tpu.memory_space<vmem>>, vector<8x32xf32>,
    return
  }
  func.func @transform_0(%arg0: i32) -> (i32, i32) {
    %c0_i32 = arith.constant 0 : i32
    %c0_i32_0 = arith.constant 0 : i32
    return %arg0, %c0_i32 : i32, i32
  }
  func.func @transform_1(%arg0: i32) -> (i32, i32) {
    %c0_i32 = arith.constant 0 : i32
    %c0_i32_0 = arith.constant 0 : i32
    %c0_i32_1 = arith.constant 0 : i32
    return %c0_i32, %c0_i32_0 : i32, i32
  }
  func.func @transform_2(%arg0: i32) -> (i32, i32) {
    %c0_i32 = arith.constant 0 : i32
    %c0_i32_0 = arith.constant 0 : i32
    %c0_i32_1 = arith.constant 0 : i32
    return %c0_i32, %c0_i32_0 : i32, i32
  }
  func.func @transform_3(%arg0: i32) -> (i32, i32) {
    %c0_i32 = arith.constant 0 : i32
    %c0_i32_0 = arith.constant 0 : i32
    %c0_i32_1 = arith.constant 0 : i32
    return %c0_i32, %c0_i32_0 : i32, i32
  }
  func.func @transform_4(%arg0: i32) -> (i32, i32) {
    %c0_i32 = arith.constant 0 : i32
    %c0_i32_0 = arith.constant 0 : i32
    %c0_i32_1 = arith.constant 0 : i32
    return %c0_i32, %c0_i32_0 : i32, i32
  }
  func.func @transform_5(%arg0: i32) -> (i32, i32) {
    %c0_i32 = arith.constant 0 : i32
    %c0_i32_0 = arith.constant 0 : i32
    return %arg0, %c0_i32 : i32, i32
  }
}

</mosaic_0001>

<bundles_post_ra>
// kernel: mlp_pallas.1
= control target key start
LH: loop header
LB: loop body
LE: loop exit
PB: predicated region body
PF: predicated region fallthrough
CT: control target
= control target key end

     0   :  { %10 = vsyncpa [#allocation3], 0  ;;  %s862_s0 = inlined_call_operand.vmem [shape: f32[16,32], index: 0, kind: input, shape index: {}]   ;;  %s863_s1 = inlined_call_operand.vmem [shape: f32[32,64], index: 1, kind: input, shape index: {}]   ;;  %s864_s2 = inlined_call_operand.vmem [shape: f32[1,64], index: 2, kind: input, shape index: {}]   ;;  %s865_s3 = inlined_call_operand.vmem [shape: f32[64,32], index: 3, kind: input, shape index: {}]   ;;  %s866_s4 = inlined_call_operand.vmem [shape: f32[1,32], index: 4, kind: input, shape index: {}]   ;;  %s867_s5 = inlined_call_operand.hbm [shape: f32[16,32], index: 5, kind: output, shape index: {}]  }
   0x1   :  { %12 = vsyncpa [#allocation3 + $0x1], 0  ;;  %s718_s18 = smov 0   ;;  %s720_s19 = smov 0  }
   0x2   :  { %s722_s20 = smov 0   ;;  %s724_s21 = smov 0  }
   0x3 LB: > { %s739_s22 = sadd.s32 4294967295, %s681_s21   ;;  %s496_s23 = sadd.s32 4294967294, %s681_s21   ;;  %s681_s21 = sphi %s724_s21, %s873_s21   ;;  %s677_s20 = sphi %s722_s20, %s872_s20   ;;  %s673_s19 = sphi %s720_s19, %s871_s19   ;;  %s669_s18 = sphi %s718_s18, %s870_s18  }
   0x4   : > { %s743_s24 = sadd.s32 1, %s681_s21   ;;  %s135_s25 = sadd.s32 1, %s677_s20 }
   0x5   : > { %s132_s26 = ssub.s32 %s681_s21, %s743_s24  ;;  %p145_p0 = scmp.ne.s32.totalorder %s677_s20, %s673_s19 }
   0x6   : > { %p133_p1 = scmp.eq.s32.totalorder %s132_s26, 0  ;;  %p146_p2 = scmp.eq.s32.totalorder %s739_s22, 1 }
   0x7   : > { %p151_p3 = scmp.ne.s32.totalorder %s673_s19, %s669_s18  ;;  %p152_p4 = scmp.eq.s32.totalorder %s496_s23, 1 }
   0x8   : > { %s754_s27 = scalar_select %p133_p1, %s677_s20, %s135_s25  }
   0x9   : > { %p756_p5 = por %p146_p2, %p145_p0  ;;  %p760_p6 = por %p152_p4, %p151_p3 }
   0xa   : > { %p499_p7 = scmp.ge.s32.totalorder %s681_s21, 1  ;;  %p189_p8 = scmp.lt.s32.totalorder %s681_s21, 3 }
   0xc   : > { %p190_p9 = pnand %p499_p7, %p189_p8 }
   0xd   : > { %v221_v0 = vld [vmem:[%s863_s1] sm:$0xff] (!%p190_p9)  ;;  %v222_v1 = vld [vmem:[%s863_s1 + $0x8] sm:$0xff] (!%p190_p9)  ;;  %v223_v2 = vld [vmem:[%s863_s1 + $0x10] sm:$0xff] (!%p190_p9)  ;;  %v683_v3 = vmov (!%p190_p9), 0.0|0.0   ;;  %vm684_vm0 = vmmov (!%p190_p9), 0   ;;  %v685_v6 = vmov (!%p190_p9), 0.0  }
   0xe   : > { %193 = sbr.rel (%p190_p9) target bundleno = 515 (0x203), region = 40  ;;  %554 = vmatprep.subr.bf16.mxu0 (!%p190_p9), %v683_v3  ;;  %v555_v4 = vpack.c.bf16 (!%p190_p9), %v222_v1, %v221_v0  ;;  %v224_v5 = vld [vmem:[%s863_s1 + $0x18] sm:$0xff] (!%p190_p9)  ;;  %532 = vmatprep.mubr.msk.f32.mxu0 (!%p190_p9), %vm684_vm0, %v685_v6  ;;  %p216_p10 = scmp.lt.s32.totalorder (!%p190_p9), %s739_s22, 1  ;;  %vm232_vm1 = vcmask (!%p190_p9), 261120   ;;  %v333_v9 = vld [vmem:[%s865_s3] sm:$0xff] (!%p190_p9)  ;;  %v334_v10 = vld [vmem:[%s865_s3 + $0x8] sm:$0xff] (!%p190_p9) }
   0xf   : > { %560 = vmatprep.subr.bf16.mxu1 (!%p190_p9), %v683_v3  ;;  %551 = vmatprep.mubr.msk.f32.mxu1 (!%p190_p9), %vm684_vm0, %v685_v6  ;;  %v558_v7 = vpack.c.bf16 (!%p190_p9), %v224_v5, %v223_v2  ;;  %v561_v11 = vpack.c.bf16 (!%p190_p9), %v334_v10, %v333_v9  ;;  %v335_v12 = vld [vmem:[%s865_s3 + $0x10] sm:$0xff] (!%p190_p9)  ;;  %v336_v13 = vld [vmem:[%s865_s3 + $0x18] sm:$0xff] (!%p190_p9)  ;;  %v337_v15 = vld [vmem:[%s865_s3 + $0x20] sm:$0xff] (!%p190_p9)  ;;  %v686_v45 = vmov (!%p190_p9), -1.0   ;;  %vm348_vm3 = vcmask (!%p190_p9), 523264   ;;  %s213_s26 = sand.u32 (!%p190_p9), 1, %s673_s19  }
  0x10   : > { %556 = vmatpush3.bf16.msra.mxu0 (!%p190_p9), %v555_v4  ;;  %v564_v14 = vpack.c.bf16 (!%p190_p9), %v336_v13, %v335_v12  ;;  %v338_v16 = vld [vmem:[%s865_s3 + $0x28] sm:$0xff] (!%p190_p9)  ;;  %v339_v18 = vld [vmem:[%s865_s3 + $0x30] sm:$0xff] (!%p190_p9)  ;;  %v340_v19 = vld [vmem:[%s865_s3 + $0x38] sm:$0xff] (!%p190_p9)  ;;  %s500_s30 = sshll.u32 (!%p190_p9), %s213_s26, 3  ;;  %s507_s8 = sshll.u32 (!%p190_p9), %s739_s22, 7 }
  0x11   : > { %557 = vmatprep.subr.bf16.mxu0 (!%p190_p9), %v683_v3  ;;  %562 = vmatpush3.bf16.msra.mxu1 (!%p190_p9), %v561_v11  ;;  %v567_v17 = vpack.c.bf16 (!%p190_p9), %v338_v16, %v337_v15  ;;  %v570_v20 = vpack.c.bf16 (!%p190_p9), %v340_v19, %v339_v18  ;;  %v502_v21 = vld [vmem:[%s864_s2] ss:$0 sm:$0xff] (!%p190_p9)  ;;  %s215_s9 = scalar_lea.vmem (!%p190_p9), [#allocation2], %s500_s30 }
  0x12   : > { %563 = vmatprep.subr.bf16.mxu1 (!%p190_p9), %v683_v3  ;;  %v504_v51 = vld [vmem:[%s866_s4] ss:$0 sm:$0xff] (!%p190_p9)  ;;  %s437_s10 = sshll.u32 (!%p190_p9), %s215_s9, 4  ;;  %s821_s10 = int_to_ptr.vmem [resolvable:$true] %s437_s10 }
  0x13   : > { %s619_s15 = scalar_lea.vmem (!%p190_p9), %s821_s10, 128 }
  0x14   : > { %559 = vmatpush3.bf16.msra.mxu0 (!%p190_p9), %v558_v7  ;;  %p620_p11 = scmp.ne.s32.totalorder (!%p190_p9), %s821_s10, %s619_s15 }
  0x15   : > { %s217_s13 = scalar_select %p216_p10, %s739_s22, 1  ;;  %565 = vmatpush3.bf16.msra.mxu1 %v564_v14 }
  0x16   : > { %566 = vmatprep.subr.bf16.mxu1 %v683_v3  ;;  %p621_p12 = pnand %p620_p11, %p756_p5  ;;  %s687_s22 = smov [#allocation2]  }
  0x17   : > { %s501_s14 = sshll.u32 %s217_s13, 3  ;;  %s819_s13 = scalar_lea.hbm %s867_s5, %s507_s8 }
  0x18   : > { %s219_s17 = scalar_lea.vmem %s862_s0, %s501_s14  ;;  %s424_s14 = scalar_lea.sflag [#allocation3], %s213_s26 }
  0x19   : > { %v220_v8 = vld [vmem:[%s219_s17] sm:$0xff]  ;;  %568 = vmatpush3.bf16.msra.mxu1 %v567_v17  ;;  %p622_p13 = pneg %p621_p12  ;;  %s623_s16 = sshll.u32 %s687_s22, 4  ;;  %s624_s16 = int_to_ptr.vmem [resolvable:$false] %s623_s16 }
  0x1a   : > { %533 = vmatmul.mubr.msk.f32.vlgmr.msra.gmra.mrb[0].mxu0 %vm232_vm1, %v220_v8  ;;  %569 = vmatprep.subr.bf16.mxu1 %v683_v3  ;;  %s625_s17 = scalar_lea.vmem %s624_s16, 256  ;;  %p626_p0 = scmp.lt.s32.totalorder %s821_s10, %s624_s16 }
  0x1b   : > { %p627_p1 = scmp.lt.s32.totalorder %s625_s17, %s619_s15 }
  0x1d   : > { %571 = vmatpush3.bf16.msra.mxu1 %v570_v20  ;;  %p628_p2 = por %p627_p1, %p626_p0 }
  0x1f   : > { %p629_p3 = pnand %p628_p2, %p622_p13 }
  0xed   : > { %v302_v22 = vpop.f32.mrb[0].mxu0 }
  0xee   : > { %v303_v23 = vadd.f32 %v502_v21, %v302_v22  ;;  %v534_v24 = vpop.f32.mrb[1].mxu0 }
  0xf0   : > { %v307_v25 = vmul.f32 0.70710677, %v303_v23  ;;  %v306_v48 = vmul.f32 0.5, %v303_v23 }
  0xf2   : > { %v310_v26 = vand.u32 2147483647, %v307_v25  ;;  %vm308_vm2 = vcmp.ge.f32.partialorder %v307_v25, 0.0 }
  0xf3   : > { %v309_v46 = vsel %vm308_vm2, 1.0, %v686_v45 }
  0xf4   : > { %v311_v27 = vmul.f32 0.3275911, %v310_v26  ;;  %v324_v29 = vmul.f32 %v310_v26, %v310_v26 }
  0xf6   : > { %v312_v28 = vadd.f32 1.0, %v311_v27  ;;  %v325_v31 = vsub.f32 0.0, %v324_v29 }
  0xf8   : > { %615 = vrcp.f32 %v312_v28  ;;  %v326_v34 = vmul.f32 1.442695, %v325_v31 }
  0xfa   : > { %617 = vpow2.f32 %v326_v34 }
 0x102   : > { %v616_v30 = vpop.eup %615 }
 0x103   : > { %v315_v32 = vmul.f32 1.0614054, %v616_v30 }
 0x104   : > { %v618_v42 = vpop.eup %617 }
 0x105   : > { %v316_v33 = vadd.f32 -1.4531521, %v315_v32 }
 0x107   : > { %v317_v35 = vmul.f32 %v616_v30, %v316_v33 }
 0x109   : > { %v318_v36 = vadd.f32 1.4214138, %v317_v35 }
 0x10b   : > { %v319_v37 = vmul.f32 %v616_v30, %v318_v36 }
 0x10d   : > { %v320_v38 = vadd.f32 -0.28449672, %v319_v37 }
 0x10f   : > { %v321_v39 = vmul.f32 %v616_v30, %v320_v38 }
 0x111   : > { %v322_v40 = vadd.f32 0.2548296, %v321_v39 }
 0x113   : > { %v323_v41 = vmul.f32 %v616_v30, %v322_v40 }
 0x115   : > { %v328_v43 = vmul.f32 %v618_v42, %v323_v41 }
 0x117   : > { %v329_v44 = vsub.f32 1.0, %v328_v43 }
 0x119   : > { %v330_v47 = vmul.f32 %v329_v44, %v309_v46 }
 0x11b   : > { %v331_v49 = vadd.f32 1.0, %v330_v47 }
 0x11d   : > { %v332_v50 = vmul.f32 %v331_v49, %v306_v48 }
 0x11f   : > { %552 = vmatmul.mubr.msk.f32.vlgmr.msra.gmra.mrb[0].mxu1 %vm348_vm3, %v332_v50 }
 0x1f2   : > { %v418_v52 = vpop.f32.mrb[0].mxu1 }
 0x1f3   : > { %v419_v53 = vadd.f32 %v504_v51, %v418_v52  ;;  %v553_v54 = vpop.f32.mrb[1].mxu1 }
 0x1f5   : > { %422 = vst.msk [vmem:[%s215_s9] sm:$0xff] %vm232_vm1, %v419_v53 }
 0x1f6   : > { %632 = shalt.err (!%p629_p3)
}
 0x1f7   : > { %s633_s23 = scalar_lea.hbm %s819_s13, 128  ;;  %s637_s30 = scalar_lea.hbm %s867_s5, 256 }
 0x1f8   : > { %p634_p4 = scmp.ne.s32.totalorder %s819_s13, %s633_s23  ;;  %p638_p9 = scmp.lt.u32.totalorder %s819_s13, %s867_s5 }
 0x1f9   : > { %p639_p10 = scmp.lt.u32.totalorder %s637_s30, %s633_s23  ;;  %p641_p12 = scmp.lt.u32.totalorder %s633_s23, %s819_s13 }
 0x1fa   : > { %p635_p7 = pnand %p634_p4, %p756_p5 }
 0x1fb   : > { %p640_p11 = por %p639_p10, %p638_p9 }
 0x1fc   : > { %p636_p8 = pneg %p635_p7 }
 0x1fd   : > { %p642_p13 = por %p641_p12, %p640_p11 }
 0x1ff   : > { %p643_p0 = pnand %p642_p13, %p636_p8 }
 0x201   : > { %646 = shalt.err (!%p643_p0)
}
 0x202   : > { %572 = dma.vmem_to_hbm [thread:$0]  (%p756_p5), %s821_s10, 128, %s819_s13, %s424_s14  }
 0x203 PF: > { %p578_p1 = scmp.ge.s32.totalorder %s681_s21, 2  ;;  %s449_s8 = sand.u32 1, %s669_s18  }
 0x204   : > { %s450_s9 = scalar_lea.sflag [#allocation3], %s449_s8 }
 0x205   : > { %p575_p2 = pnand %p578_p1, %p760_p6 }
 0x207   : > { %664 = dma.done.wait (!%p575_p2), %s450_s9, 128  }
 0x208   : > { %666 = vsyncadd (!%p575_p2), %s450_s9, 4294967168  ;;  %p15_p3 = scmp.ge.s32.totalorder %s743_s24, 4   ;;  %s870_s18 = smov %s673_s19 }
 0x209   : > { %s871_s19 = smov %s677_s20  ;;  %s872_s20 = smov %s754_s27 }
 0x20a   : > { %s873_s21 = smov %s743_s24  ;;  %17 = sbr.rel (!%p15_p3) target bundleno = 3 (0x3), region = 75 }
 0x211   :  { %455 = vsyncpa [#allocation3], 1 }
 0x212   :  { %457 = vsyncpa [#allocation3 + $0x1], 1 }

</bundles_post_ra>
